<compile_context>
chip_gen: v7x
topology: tpu7x:2x2x1
jax: 0.10.0
libtpu: 0.0.40
codegen_flags: <defaults>
</compile_context>

<pallas_src>
import jax
import jax.numpy as jnp
from jax.experimental import pallas as pl
from jax.experimental.pallas import tpu as pltpu


def _round_up(a: int, b: int) -> int:
    return ((a + b - 1) // b) * b


def _sigmoid_loss_kernel(logits_ref, labels_ref, weights_ref, out_ref):
    x = logits_ref[...].astype(jnp.float32)       # (TB, Cp), cast from native dtype in VMEM
    labels = labels_ref[...]                       # (TB, 1) int32; padded rows hold -1
    w = weights_ref[...].astype(jnp.float32)       # (1, Cp); padded classes hold weight 0

    tb, cp = x.shape

    # Multi-hot targets via broadcast compare (pure VPU): target[b, c] = 1.0 iff c == labels[b].
    cls_iota = jax.lax.broadcasted_iota(jnp.int32, (tb, cp), 1)
    t = (cls_iota == labels).astype(jnp.float32)

    # Numerically-stable binary_cross_entropy_with_logits (reduction='none'), per-class weighted:
    #   loss = max(x, 0) - x * t + log1p(exp(-|x|))
    # Padded rows (x = -1e4, t = 0) evaluate to exactly 0; padded classes are zeroed by w.
    loss = (jnp.maximum(x, 0.0) - x * t + jnp.log1p(jnp.exp(-jnp.abs(x)))) * w

    # Vreg-blocked partial sum: each (i0, j) slice of the reshape is exactly one (8,128) tile of
    # the original layout, so this lowers to elementwise vreg adds (no cross-lane XLU reduce,
    # no scalar broadcast/select on the output).
    out_ref[...] = loss.reshape(tb // 8, 8, cp // 128, 128).sum(axis=(0, 2))


def sigmoid_loss(pred_logits, targets, per_cls_weights=None, *, tile_b=None):
    """pred_logits: (B, C) float (any dtype), targets: (B,) int, per_cls_weights: (C,) -> scalar f32."""
    B, C = pred_logits.shape
    itemsize = pred_logits.dtype.itemsize

    if per_cls_weights is None:
        per_cls_weights = jnp.ones((C,), dtype=jnp.float32)

    # Lane-dense class axis: pad C up to a multiple of 128.
    Cp = max(128, _round_up(C, 128))

    # Sublane multiple for the native dtype (8 for f32, 16 for bf16, 32 for int8).
    sub = max(8, 32 // itemsize)
    B_sub = _round_up(B, sub)

    if tile_b is None:
        # Bytes-targeted tile: ~4 MiB of native-dtype logits per block ...
        target_logits_bytes = 4 * 1024 * 1024
        tile_by_bytes = max(sub, ((target_logits_bytes // (Cp * itemsize)) // sub) * sub)
        # ... clamped so the estimated total VMEM footprint stays under ~24 MiB:
        # 2x logits buffers + 2x lane-padded (TB,128) i32 labels buffers + ~4 tile-sized f32 temps.
        per_row_bytes = 2 * Cp * itemsize + 2 * 128 * 4 + 4 * Cp * 4
        tile_by_vmem = max(sub, (((24 * 1024 * 1024) // per_row_bytes) // sub) * sub)
        tile_b = min(tile_by_bytes, tile_by_vmem, B_sub)

        # v7x megacore: make sure the parallel grid axis has >= 2 tiles when the batch allows,
        # so both TensorCores get work (harmless extra grid step on single-TC chips).
        if tile_b >= B_sub and B_sub >= 2 * sub:
            tile_b = _round_up((B_sub + 1) // 2, sub)
    else:
        tile_b = max(sub, _round_up(min(tile_b, B_sub), sub))

    num_tiles = (B + tile_b - 1) // tile_b
    Bp = num_tiles * tile_b

    # Pad inputs in native dtype (kernel casts to f32 in VMEM).
    x = pred_logits
    if Cp != C:
        x = jnp.pad(x, ((0, 0), (0, Cp - C)))                       # inert: weight 0 on padded cols
    if Bp != B:
        # Large finite negative (NOT -inf: -inf * 0 from the x*t term would give NaN).
        x = jnp.pad(x, ((0, Bp - B), (0, 0)), constant_values=-1e4)  # padded rows contribute 0

    labels = targets.astype(jnp.int32).reshape(B, 1)
    if Bp != B:
        labels = jnp.pad(labels, ((0, Bp - B), (0, 0)), constant_values=-1)

    w = jnp.asarray(per_cls_weights, dtype=jnp.float32).reshape(1, C)
    if Cp != C:
        w = jnp.pad(w, ((0, 0), (0, Cp - C)))                        # zero weights -> padded classes inert

    # Real VMEM footprint (incl. the lane-padded labels buffer), capped at 32 MiB (safe on v7x).
    logits_buf = tile_b * Cp * itemsize
    labels_buf = _round_up(tile_b, 8) * 128 * 4     # (TB, 1) int32 block lane-pads to (TB, 128) in VMEM
    weights_buf = 8 * Cp * 4
    out_buf = 8 * 128 * 4
    pipeline_bytes = 2 * (logits_buf + labels_buf + weights_buf + out_buf)
    interm_bytes = 4 * tile_b * Cp * 4               # f32 temporaries in the kernel body
    vmem_bytes = int(min(32 * 1024 * 1024,
                         max(8 * 1024 * 1024, pipeline_bytes + interm_bytes + (2 << 20))))

    partials = pl.pallas_call(
        _sigmoid_loss_kernel,
        out_shape=jax.ShapeDtypeStruct((num_tiles * 8, 128), jnp.float32),
        grid_spec=pl.GridSpec(
            grid=(num_tiles,),
            in_specs=[
                pl.BlockSpec((tile_b, Cp), lambda i: (i, 0)),   # logits: streamed per tile
                pl.BlockSpec((tile_b, 1), lambda i: (i, 0)),    # labels: streamed per tile
                pl.BlockSpec((1, Cp), lambda i: (0, 0)),        # weights: resident (same block)
            ],
            out_specs=pl.BlockSpec((8, 128), lambda i: (i, 0)),  # lane-dense per-tile partials
        ),
        compiler_params=pltpu.CompilerParams(
            dimension_semantics=("parallel",),   # independent tiles -> megacore-friendly on v7x
            vmem_limit_bytes=vmem_bytes,
        ),
    )(x, labels, w)

    # Trivial XLA reduce of the per-tile partials; divide by the true batch size exactly once.
    return jnp.sum(partials) / jnp.float32(B)


def _reference(pred_logits, targets, per_cls_weights):
    # Pure-JAX reference mirroring the PyTorch module.
    B, C = pred_logits.shape
    t = jax.nn.one_hot(targets, C, dtype=jnp.float32)
    x = pred_logits.astype(jnp.float32)
    loss = jnp.maximum(x, 0.0) - x * t + jnp.log1p(jnp.exp(-jnp.abs(x)))
    loss = loss * jnp.asarray(per_cls_weights, jnp.float32)[None, :]
    return jnp.sum(loss) / B


if __name__ == "__main__":
    key = jax.random.PRNGKey(0)
    k1, k2, k3 = jax.random.split(key, 3)

    B, C = 8, 32
    pred_logits = jax.random.normal(k1, (B, C), dtype=jnp.float32)
    targets = jax.random.randint(k2, (B,), 0, C, dtype=jnp.int32)
    per_cls_weights = jax.random.uniform(k3, (C,), dtype=jnp.float32, minval=0.5, maxval=1.5)

    out = sigmoid_loss(pred_logits, targets, per_cls_weights)
    out = jax.block_until_ready(out)

    ref = _reference(pred_logits, targets, per_cls_weights)
    assert jnp.allclose(out, ref, rtol=1e-5, atol=1e-5), (out, ref)

    print("KERNEL_OK")
</pallas_src>

<mosaic_0001>
module attributes {stable_mosaic.version = 11 : i64} {
  func.func @_sigmoid_loss_kernel(%arg0: i32, %arg1: memref<8x128xf32, #tpu.memory_space<vmem>>, %arg2: memref<8x1xi32, #tpu.memory_space<vmem>>, %arg3: memref<1x128xf32, #tpu.memory_space<vmem>>, %arg4: memref<8x128xf32, #tpu.memory_space<vmem>>) attributes {dimension_semantics = [#tpu.dimension_semantics<parallel>], iteration_bounds = array<i64: 1>, scalar_prefetch = 0 : i64, scratch_operands = 0 : i64, tpu.core_type = #tpu.core_type<tc>, window_params = [{transform_indices = @transform_0, window_bounds = array<i64: 8, 128>}, {transform_indices = @transform_1, window_bounds = array<i64: 8, 1>}, {pipeline_mode = #tpu.pipeline_mode<synchronous>, transform_indices = @transform_2, window_bounds = array<i64: 1, 128>}, {transform_indices = @transform_3, window_bounds = array<i64: 8, 128>}]} {
    %c0 = arith.constant 0 : index
    %c0_0 = arith.constant 0 : index
    %0 = vector.load %arg1[%c0, %c0_0] : memref<8x128xf32, #tpu.memory_space<vmem>>, vector<8x128xf32>
    %c0_1 = arith.constant 0 : index
    %c0_2 = arith.constant 0 : index
    %1 = vector.load %arg2[%c0_1, %c0_2] : memref<8x1xi32, #tpu.memory_space<vmem>>, vector<8x1xi32>
    %c0_3 = arith.constant 0 : index
    %c0_4 = arith.constant 0 : index
    %2 = vector.load %arg3[%c0_3, %c0_4] : memref<1x128xf32, #tpu.memory_space<vmem>>, vector<1x128xf32>
    %3 = tpu.iota {dimensions = array<i32: 1>} : vector<8x128xi32>
    %4 = vector.broadcast %1 : vector<8x1xi32> to vector<8x128xi32>
    %5 = arith.cmpi eq, %3, %4 : vector<8x128xi32>
    %6 = arith.extui %5 : vector<8x128xi1> to vector<8x128xi32>
    %7 = arith.sitofp %6 : vector<8x128xi32> to vector<8x128xf32>
    %cst = arith.constant 0.000000e+00 : f32
    %8 = vector.broadcast %cst : f32 to vector<8x128xf32>
    %9 = arith.maximumf %0, %8 : vector<8x128xf32>
    %10 = arith.mulf %0, %7 : vector<8x128xf32>
    %11 = arith.subf %9, %10 : vector<8x128xf32>
    %12 = math.absf %0 : vector<8x128xf32>
    %cst_5 = arith.constant 0.000000e+00 : f32
    %13 = vector.broadcast %cst_5 : f32 to vector<8x128xf32>
    %14 = arith.subf %13, %12 : vector<8x128xf32>
    %15 = math.exp %14 : vector<8x128xf32>
    %16 = math.log1p %15 : vector<8x128xf32>
    %17 = arith.addf %11, %16 : vector<8x128xf32>
    %18 = vector.broadcast %2 : vector<1x128xf32> to vector<8x128xf32>
    %19 = arith.mulf %17, %18 : vector<8x128xf32>
    %20 = vector.shape_cast %19 : vector<8x128xf32> to vector<1x8x1x128xf32>
    %cst_6 = arith.constant dense<0.000000e+00> : vector<8x128xf32>
    %21 = vector.multi_reduction <add>, %20, %cst_6 [0, 2] : vector<1x8x1x128xf32> to vector<8x128xf32>
    %c0_7 = arith.constant 0 : index
    %c0_8 = arith.constant 0 : index
    %22 = vector.load %arg4[%c0_7, %c0_8] : memref<8x128xf32, #tpu.memory_space<vmem>>, vector<8x128xf32>
    tpu.vector_store %arg4[%c0_7, %c0_8], %21 {strides = array<i32>} : memref<8x128xf32, #tpu.memory_space<vmem>>, vector<8x128xf32>,
    return
  }
  func.func @transform_0(%arg0: i32) -> (i32, i32) {
    %c0_i32 = arith.constant 0 : i32
    %c0_i32_0 = arith.constant 0 : i32
    return %arg0, %c0_i32 : i32, i32
  }
  func.func @transform_1(%arg0: i32) -> (i32, i32) {
    %c0_i32 = arith.constant 0 : i32
    %c0_i32_0 = arith.constant 0 : i32
    return %arg0, %c0_i32 : i32, i32
  }
  func.func @transform_2(%arg0: i32) -> (i32, i32) {
    %c0_i32 = arith.constant 0 : i32
    %c0_i32_0 = arith.constant 0 : i32
    %c0_i32_1 = arith.constant 0 : i32
    return %c0_i32, %c0_i32_0 : i32, i32
  }
  func.func @transform_3(%arg0: i32) -> (i32, i32) {
    %c0_i32 = arith.constant 0 : i32
    %c0_i32_0 = arith.constant 0 : i32
    return %arg0, %c0_i32 : i32, i32
  }
}

</mosaic_0001>

<bundles_post_ra>
// kernel: tpu_custom_call.1
= control target key start
LH: loop header
LB: loop body
LE: loop exit
PB: predicated region body
PF: predicated region fallthrough
CT: control target
= control target key end

     0   :  { %s144_s0 = inlined_call_operand.vmem [shape: f32[8,128], index: 0, kind: input, shape index: {}]   ;;  %s145_s1 = inlined_call_operand.vmem [shape: s32[8,1], index: 1, kind: input, shape index: {}]   ;;  %s146_s2 = inlined_call_operand.vmem [shape: f32[1,128], index: 2, kind: input, shape index: {}]   ;;  %s147_s3 = inlined_call_operand.hbm [shape: f32[8,128], index: 3, kind: output, shape index: {}]  }
   0x1   :  { %v16_v0 = vld [vmem:[%s145_s1] sm:$0xff] }
   0x2   :  { %8 = vsyncpa [#allocation3], 0  ;;  %v100_v1 = vmov 0   ;;  %v15_v2 = vld [vmem:[%s144_s0] sm:$0xff]  ;;  %v18_v9 = vlaneseq  ;;  %v101_v18 = vmov 0.0   ;;  %s102_s16 = smov [#allocation2]  }
   0x3   :  { %71 = vset.pattern.permute.xlu0 %v100_v1  ;;  %v29_v3 = vand.u32 2147483647, %v15_v2  ;;  %v26_v17 = vmax.f32 %v15_v2, 0.0  ;;  %v67_v23 = vld [vmem:[%s146_s2] ss:$0 sm:$0xff]  ;;  %s58_s17 = sshll.u32 %s102_s16, 4  ;;  %s59_s17 = int_to_ptr.vmem [resolvable:$true] %s58_s17 }
   0x4   :  { %21 = vperm.xlu0 %71, %v16_v0   ;;  %v19_v12 = vand.u32 127, %v18_v9  ;;  %s76_s18 = scalar_lea.vmem %s59_s17, 128  ;;  %p81_p1 = scmp.lt.s32.totalorder %s59_s17, %s59_s17 }
   0x5   :  { %v30_v4 = vsub.f32 0.0, %v29_v3  ;;  %p77_p0 = scmp.ne.s32.totalorder %s59_s17, %s76_s18  ;;  %p82_p2 = scmp.lt.s32.totalorder %s76_s18, %s76_s18 }
   0x7   :  { %v31_v5 = vmul.f32 1.442695, %v30_v4  ;;  %p83_p3 = por %p82_p2, %p81_p1 }
   0x9   :  { %72 = vpow2.f32 %v31_v5  ;;  %p84_p4 = pnand %p83_p3, %p77_p0 }
  0x13   :  { %v73_v6 = vpop.eup %72 }
  0x14   :  { %v33_v7 = vadd.f32 1.0, %v73_v6  ;;  %v36_v8 = vmul.f32 -0.5, %v73_v6  ;;  %v39_v13 = vand.u32 2147483647, %v73_v6 }
  0x16   :  { %74 = vlog2.f32 %v33_v7  ;;  %v37_v10 = vadd.f32 1.0, %v36_v8  ;;  %vm40_vm1 = vcmp.lt.f32.partialorder %v39_v13, 0.0004427343 }
  0x18   :  { %v38_v16 = vmul.f32 %v73_v6, %v37_v10 }
  0x20   :  { %v75_v11 = vpop.eup %74 }
  0x21   :  { %v35_v15 = vmul.f32 0.6931472, %v75_v11 }
  0x23   :  { %v41_v21 = vsel %vm40_vm1, %v38_v16, %v35_v15 }
  0x83   :  { %v22_v14 = vpop.permute.xlu0 %21 }
  0x84   :  { %vm23_vm0 = vcmp.eq.s32.totalorder %v19_v12, %v22_v14 }
  0x85   :  { %v66_v19 = vsel %vm23_vm0, 1.0, %v101_v18 }
  0x86   :  { %v27_v20 = vmul.f32 %v66_v19, %v15_v2 }
  0x88   :  { %v28_v22 = vsub.f32 %v26_v17, %v27_v20 }
  0x8a   :  { %v42_v24 = vadd.f32 %v41_v21, %v28_v22 }
  0x8c   :  { %v49_v25 = vmul.f32 %v67_v23, %v42_v24 }
  0x8e   :  { %51 = vst [vmem:[#allocation2] sm:$0xff] %v49_v25 }
  0x8f   :  { %87 = shalt.err (!%p84_p4)
}
  0x90   :  { %s88_s21 = scalar_lea.hbm %s147_s3, 128 }
  0x91   :  { %p89_p5 = scmp.ne.s32.totalorder %s147_s3, %s88_s21  ;;  %p92_p6 = scmp.lt.u32.totalorder %s88_s21, %s147_s3 }
  0x93   :  { %p94_p7 = pnand %p92_p6, %p89_p5 }
  0x95   :  { %97 = shalt.err (!%p94_p7)
}
  0x96   :  { %61 = dma.vmem_to_hbm [thread:$0]  %s59_s17, 128, %s147_s3, [#allocation3]  }
  0x97   :  { %98 = dma.done.wait [#allocation3], 128  }
  0x98   :  { %99 = vsyncadd [#allocation3], 4294967168 }
  0x99   :  { %65 = vsyncpa [#allocation3], 1 }

</bundles_post_ra>
